<compile_context>
chip_gen: v7x
topology: tpu7x:2x2x1
jax: 0.10.0
libtpu: 0.0.40
codegen_flags: <defaults>
</compile_context>

<pallas_src>
import functools

import jax
import jax.numpy as jnp
from jax.experimental import pallas as pl
from jax.experimental.pallas import tpu as pltpu


def _round_up(x, m):
    return ((x + m - 1) // m) * m


def _choose_tiling(B, N):
    """Pick a lane tile (multiple of 128) so 2x(in+out) double-buffered blocks
    stay well under the smallest scoped-VMEM default (16 MiB on v5e)."""
    n128 = _round_up(N, 128)
    budget_bytes = 12 * 1024 * 1024
    bytes_per_lane = 4 * (3 * B) * 4          # 4 buffers x 3B rows x 4 bytes
    max_tile = max(128, (budget_bytes // bytes_per_lane) // 128 * 128)
    n_tile = min(n128, max_tile, 8192)
    n_pad = _round_up(N, n_tile)
    return n_tile, n_pad


# ----------------------------------------------------------------------------
# Fused Pallas kernel: rigid+scale transform of all frames for one vertex tile
# plus temporal-smoothness partial sum.
# ----------------------------------------------------------------------------
def _fused_kernel(rot_ref, trans_ref, scale_ref, vog_ref, out_ref, smooth_ref,
                  acc_ref, *, B, n_valid, n_tile, inv_count, padded):
    """One vertex tile (all B frames) per grid step.

    rot_ref   : SMEM (B*9,)  row-major rotation matrices
    trans_ref : SMEM (B*3,)
    scale_ref : SMEM (1,)
    vog_ref   : VMEM (B*3, n_tile)   original verts, rows = frame-major xyz
    out_ref   : VMEM (B*3, n_tile)   transformed verts
    smooth_ref: SMEM (1,)            smoothness loss (written at last tile)
    acc_ref   : SMEM (1,)            cross-tile accumulator
    """
    n = pl.program_id(0)

    @pl.when(n == 0)
    def _():
        acc_ref[0] = 0.0

    s = scale_ref[0]

    if padded:
        lane = jax.lax.broadcasted_iota(jnp.int32, (1, n_tile), 1) + n * n_tile
        valid = (lane < n_valid).astype(jnp.float32)     # (1, n_tile) 0/1 mask

    rows = []
    prev = None
    sq = None
    for b in range(B):
        v0 = vog_ref[3 * b + 0:3 * b + 1, :]             # (1, n_tile) x
        v1 = vog_ref[3 * b + 1:3 * b + 2, :]             # (1, n_tile) y
        v2 = vog_ref[3 * b + 2:3 * b + 3, :]             # (1, n_tile) z
        frame_rows = []
        for j in range(3):
            # out[:, j] = sum_k v[:, k] * R[k, j]  (R row-major: R[k,j] = rot[b*9+k*3+j])
            acc = (rot_ref[b * 9 + 0 * 3 + j] * v0
                   + rot_ref[b * 9 + 1 * 3 + j] * v1
                   + rot_ref[b * 9 + 2 * 3 + j] * v2)
            frame_rows.append(s * (acc + trans_ref[b * 3 + j]))
        frame = jnp.concatenate(frame_rows, axis=0)      # (3, n_tile)
        rows.append(frame)
        if prev is not None:
            d = frame - prev
            if padded:
                d = d * valid
            term = jnp.sum(d * d)
            sq = term if sq is None else sq + term
        prev = frame

    # Single lane-dense store of the whole (3B, n_tile) block.
    out_ref[...] = jnp.concatenate(rows, axis=0)

    if sq is not None:
        acc_ref[0] += sq * inv_count

    @pl.when(n == pl.num_programs(0) - 1)
    def _():
        smooth_ref[0] = acc_ref[0]


def fused_transform_and_smooth(vog2d, rot_flat, trans_flat, scale,
                               *, B, N, N_pad, N_tile):
    """Returns ((B*3, N_pad) transformed verts slab, scalar smoothness loss)."""
    num_tiles = N_pad // N_tile
    count = (B - 1) * 3 * N
    inv_count = (1.0 / float(count)) if B >= 2 else 0.0
    kernel = functools.partial(
        _fused_kernel, B=B, n_valid=N, n_tile=N_tile,
        inv_count=inv_count, padded=(N_pad != N))

    out2d, smooth = pl.pallas_call(
        kernel,
        out_shape=(jax.ShapeDtypeStruct((B * 3, N_pad), jnp.float32),
                   jax.ShapeDtypeStruct((1,), jnp.float32)),
        grid_spec=pltpu.PrefetchScalarGridSpec(
            num_scalar_prefetch=0,
            grid=(num_tiles,),
            in_specs=[
                pl.BlockSpec(memory_space=pltpu.MemorySpace.SMEM),   # rot (B*9,)
                pl.BlockSpec(memory_space=pltpu.MemorySpace.SMEM),   # trans (B*3,)
                pl.BlockSpec(memory_space=pltpu.MemorySpace.SMEM),   # scale (1,)
                pl.BlockSpec((B * 3, N_tile), lambda n: (0, n)),     # verts_og tile
            ],
            out_specs=[
                pl.BlockSpec((B * 3, N_tile), lambda n: (0, n)),     # verts tile
                pl.BlockSpec(memory_space=pltpu.MemorySpace.SMEM),   # smooth loss
            ],
            scratch_shapes=[pltpu.SMEM((1,), jnp.float32)],
        ),
        compiler_params=pltpu.CompilerParams(
            # "arbitrary": the SMEM scalar accumulator is carried across vertex
            # tiles; a "parallel" axis would split it across TensorCores.
            dimension_semantics=("arbitrary",),
            vmem_limit_bytes=32 * 1024 * 1024,
        ),
    )(rot_flat, trans_flat, scale, vog2d)
    return out2d, smooth[0]


# ----------------------------------------------------------------------------
# Plain-JAX glue: rot6d conversion and the HOMan_Obj module wrapper
# ----------------------------------------------------------------------------
def rot6d_to_matrix(rot_6d):
    """PHOSA/HOMan rot6d -> rotation matrix (Gram-Schmidt), rows = (b1, b2, b3)."""
    r = rot_6d.reshape(-1, 3, 2)
    a1, a2 = r[..., 0], r[..., 1]
    eps = 1e-12
    b1 = a1 / jnp.maximum(jnp.linalg.norm(a1, axis=-1, keepdims=True), eps)
    b2u = a2 - jnp.sum(b1 * a2, axis=-1, keepdims=True) * b1
    b2 = b2u / jnp.maximum(jnp.linalg.norm(b2u, axis=-1, keepdims=True), eps)
    b3 = jnp.cross(b1, b2)
    return jnp.stack([b1, b2, b3], axis=1)


class HOManObjPallas:
    """JAX/Pallas re-implementation of HOMan_Obj's forward() loss computation."""

    def __init__(self, translations_object, rotations_object6d, verts_object_og,
                 faces_object, target_masks_object, int_scale_init=1.0):
        # learnable parameters (deterministically initialised from the inputs)
        self.translations_object = jnp.asarray(translations_object, jnp.float32)
        self.rotations_object = jnp.asarray(rotations_object6d, jnp.float32)
        self.obj_rot_mult = 1.0
        # buffers
        self.verts_object_og = jnp.asarray(verts_object_og, jnp.float32)
        self.faces_object = jnp.asarray(faces_object, jnp.int32)
        self.int_scales_object = int_scale_init * jnp.ones((1,), jnp.float32)
        self.int_scale_object_mean = jnp.ones((1,), jnp.float32)
        self.ref_mask_object = (target_masks_object > 0).astype(jnp.float32)
        self.keep_mask_object = (target_masks_object >= 0).astype(jnp.float32)

        # Precompute the lane-dense constant vertex slab once (not per forward()).
        B, N, _ = self.verts_object_og.shape
        self.B, self.N = B, N
        self.N_tile, self.N_pad = _choose_tiling(B, N)
        vog_t = jnp.transpose(self.verts_object_og, (0, 2, 1))        # (B, 3, N)
        if self.N_pad != N:
            vog_t = jnp.pad(vog_t, ((0, 0), (0, 0), (0, self.N_pad - N)))
        self._vog2d = vog_t.reshape(B * 3, self.N_pad)                # (B*3, N_pad)

    # ------------------------------------------------------------------
    def _run_fused(self):
        rot = rot6d_to_matrix(self.obj_rot_mult * self.rotations_object)  # (B,3,3)
        scale = jnp.abs(self.int_scales_object)
        return fused_transform_and_smooth(
            self._vog2d,
            rot.reshape(-1).astype(jnp.float32),
            self.translations_object.reshape(-1).astype(jnp.float32),
            scale.reshape(1).astype(jnp.float32),
            B=self.B, N=self.N, N_pad=self.N_pad, N_tile=self.N_tile)

    def get_verts_object(self):
        out2d, _ = self._run_fused()
        verts_t = out2d.reshape(self.B, 3, self.N_pad)
        if self.N_pad != self.N:
            verts_t = verts_t[:, :, :self.N]
        # (B, N, 3) view for API compatibility; internal lane-dense (B, 3, N).
        return jnp.transpose(verts_t, (0, 2, 1)), verts_t

    def forward(self, loss_weights=None):
        loss_dict = {}
        metric_dict = {}
        # Single fused Pallas call: vertex transform + temporal smoothness.
        _, loss_smooth = self._run_fused()

        if loss_weights is None or loss_weights.get("lw_smooth_obj", 1.0) > 0:
            loss_dict["loss_smooth_obj"] = loss_smooth

        # TODO(synk): compute_flow_loss / compute_sil_loss_object /
        # compute_depth_loss / compute_correspondence_loss require the
        # neural_renderer rasterizer; not translatable to a Pallas kernel here.

        if loss_weights is None or loss_weights.get("lw_scale_obj", 1.0) > 0:
            loss_dict["loss_scale_obj"] = jnp.sum(
                (self.int_scales_object - self.int_scale_object_mean) ** 2)

        return loss_dict, metric_dict


# ----------------------------------------------------------------------------
# Demo / self-check
# ----------------------------------------------------------------------------
if __name__ == "__main__":
    # frames, verts (deliberately NOT a multiple of 128 to exercise padding/mask),
    # faces, mask size
    B, N, F, H, W = 5, 200, 256, 32, 32

    key = jax.random.PRNGKey(0)
    k1, k2, k3, k4, k5 = jax.random.split(key, 5)
    translations_object = 0.1 * jax.random.normal(k1, (B, 1, 3), jnp.float32)
    rotations_object6d = jax.random.normal(k2, (B, 3, 2), jnp.float32)
    verts_object_og = 0.2 * jax.random.normal(k3, (B, N, 3), jnp.float32)
    faces_object = jax.random.randint(k4, (B, F, 3), 0, N, jnp.int32)
    target_masks_object = jax.random.uniform(k5, (B, H, W), jnp.float32) - 0.3

    model = HOManObjPallas(translations_object, rotations_object6d,
                           verts_object_og, faces_object, target_masks_object,
                           int_scale_init=1.0)

    verts, verts_t = model.get_verts_object()
    loss_dict, metric_dict = model.forward()
    jax.block_until_ready(verts)
    jax.block_until_ready(loss_dict["loss_smooth_obj"])

    # pure-JAX reference for the Pallas-computed quantities
    rot = rot6d_to_matrix(model.rotations_object)
    scale = jnp.abs(model.int_scales_object)
    verts_ref = scale.reshape(-1, 1, 1) * (
        jnp.einsum("bnk,bkj->bnj", model.verts_object_og, rot)
        + model.translations_object)
    smooth_ref = jnp.mean((verts_ref[1:] - verts_ref[:-1]) ** 2)
    scale_ref = jnp.sum((model.int_scales_object - model.int_scale_object_mean) ** 2)

    assert jnp.allclose(verts, verts_ref, atol=1e-5, rtol=1e-5), "verts mismatch"
    assert jnp.allclose(loss_dict["loss_smooth_obj"], smooth_ref,
                        atol=1e-6, rtol=1e-5), "smooth loss mismatch"
    assert jnp.allclose(loss_dict["loss_scale_obj"], scale_ref,
                        atol=1e-6, rtol=1e-5), "scale loss mismatch"

    print("KERNEL_OK")
</pallas_src>

<mosaic_0001>
module attributes {stable_mosaic.version = 11 : i64} {
  func.func @_fused_kernel(%arg0: i32, %arg1: memref<45xf32, #tpu.memory_space<smem>>, %arg2: memref<15xf32, #tpu.memory_space<smem>>, %arg3: memref<1xf32, #tpu.memory_space<smem>>, %arg4: memref<15x256xf32, #tpu.memory_space<vmem>>, %arg5: memref<15x256xf32, #tpu.memory_space<vmem>>, %arg6: memref<1xf32, #tpu.memory_space<smem>>, %arg7: memref<1xf32, #tpu.memory_space<smem>>) attributes {dimension_semantics = [#tpu.dimension_semantics<arbitrary>], iteration_bounds = array<i64: 1>, scalar_prefetch = 0 : i64, scratch_operands = 1 : i64, tpu.core_type = #tpu.core_type<tc>, window_params = [{transform_indices = @transform_0, window_bounds = array<i64: 45>}, {transform_indices = @transform_1, window_bounds = array<i64: 15>}, {transform_indices = @transform_2, window_bounds = array<i64: 1>}, {transform_indices = @transform_3, window_bounds = array<i64: 15, 256>}, {transform_indices = @transform_4, window_bounds = array<i64: 15, 256>}, {transform_indices = @transform_5, window_bounds = array<i64: 1>}]} {
    %c0_i32 = arith.constant 0 : i32
    %0 = arith.cmpi eq, %arg0, %c0_i32 : i32
    %1 = arith.extui %0 : i1 to i32
    %c0_i32_0 = arith.constant 0 : i32
    %2 = arith.cmpi ne, %1, %c0_i32_0 : i32
    scf.if %2 {
      %cst_57 = arith.constant 0.000000e+00 : f32
      %c0_58 = arith.constant 0 : index
      %316 = memref.load %arg7[%c0_58] : memref<1xf32, #tpu.memory_space<smem>>
      memref.store %cst_57, %arg7[%c0_58] : memref<1xf32, #tpu.memory_space<smem>>
    } else {
    }
    %c0 = arith.constant 0 : index
    %3 = memref.load %arg3[%c0] : memref<1xf32, #tpu.memory_space<smem>>
    %4 = tpu.iota {dimensions = array<i32: 1>} : vector<1x256xi32>
    %c256_i32 = arith.constant 256 : i32
    %5 = arith.muli %arg0, %c256_i32 : i32
    %6 = vector.broadcast %5 : i32 to vector<1x256xi32>
    %7 = arith.addi %4, %6 : vector<1x256xi32>
    %c200_i32 = arith.constant 200 : i32
    %8 = vector.broadcast %c200_i32 : i32 to vector<1x256xi32>
    %9 = arith.cmpi slt, %7, %8 : vector<1x256xi32>
    %10 = arith.extui %9 : vector<1x256xi1> to vector<1x256xi32>
    %11 = arith.sitofp %10 : vector<1x256xi32> to vector<1x256xf32>
    %c0_1 = arith.constant 0 : index
    %c0_2 = arith.constant 0 : index
    %12 = vector.load %arg4[%c0_1, %c0_2] : memref<15x256xf32, #tpu.memory_space<vmem>>, vector<1x256xf32>
    %c1 = arith.constant 1 : index
    %c0_3 = arith.constant 0 : index
    %13 = vector.load %arg4[%c1, %c0_3] : memref<15x256xf32, #tpu.memory_space<vmem>>, vector<1x256xf32>
    %c2 = arith.constant 2 : index
    %c0_4 = arith.constant 0 : index
    %14 = vector.load %arg4[%c2, %c0_4] : memref<15x256xf32, #tpu.memory_space<vmem>>, vector<1x256xf32>
    %c0_5 = arith.constant 0 : index
    %15 = memref.load %arg1[%c0_5] : memref<45xf32, #tpu.memory_space<smem>>
    %16 = vector.broadcast %15 : f32 to vector<1x256xf32>
    %17 = arith.mulf %16, %12 : vector<1x256xf32>
    %c3 = arith.constant 3 : index
    %18 = memref.load %arg1[%c3] : memref<45xf32, #tpu.memory_space<smem>>
    %19 = vector.broadcast %18 : f32 to vector<1x256xf32>
    %20 = arith.mulf %19, %13 : vector<1x256xf32>
    %21 = arith.addf %17, %20 : vector<1x256xf32>
    %c6 = arith.constant 6 : index
    %22 = memref.load %arg1[%c6] : memref<45xf32, #tpu.memory_space<smem>>
    %23 = vector.broadcast %22 : f32 to vector<1x256xf32>
    %24 = arith.mulf %23, %14 : vector<1x256xf32>
    %25 = arith.addf %21, %24 : vector<1x256xf32>
    %c0_6 = arith.constant 0 : index
    %26 = memref.load %arg2[%c0_6] : memref<15xf32, #tpu.memory_space<smem>>
    %27 = vector.broadcast %26 : f32 to vector<1x256xf32>
    %28 = arith.addf %25, %27 : vector<1x256xf32>
    %29 = vector.broadcast %3 : f32 to vector<1x256xf32>
    %30 = arith.mulf %29, %28 : vector<1x256xf32>
    %c1_7 = arith.constant 1 : index
    %31 = memref.load %arg1[%c1_7] : memref<45xf32, #tpu.memory_space<smem>>
    %32 = vector.broadcast %31 : f32 to vector<1x256xf32>
    %33 = arith.mulf %32, %12 : vector<1x256xf32>
    %c4 = arith.constant 4 : index
    %34 = memref.load %arg1[%c4] : memref<45xf32, #tpu.memory_space<smem>>
    %35 = vector.broadcast %34 : f32 to vector<1x256xf32>
    %36 = arith.mulf %35, %13 : vector<1x256xf32>
    %37 = arith.addf %33, %36 : vector<1x256xf32>
    %c7 = arith.constant 7 : index
    %38 = memref.load %arg1[%c7] : memref<45xf32, #tpu.memory_space<smem>>
    %39 = vector.broadcast %38 : f32 to vector<1x256xf32>
    %40 = arith.mulf %39, %14 : vector<1x256xf32>
    %41 = arith.addf %37, %40 : vector<1x256xf32>
    %c1_8 = arith.constant 1 : index
    %42 = memref.load %arg2[%c1_8] : memref<15xf32, #tpu.memory_space<smem>>
    %43 = vector.broadcast %42 : f32 to vector<1x256xf32>
    %44 = arith.addf %41, %43 : vector<1x256xf32>
    %45 = vector.broadcast %3 : f32 to vector<1x256xf32>
    %46 = arith.mulf %45, %44 : vector<1x256xf32>
    %c2_9 = arith.constant 2 : index
    %47 = memref.load %arg1[%c2_9] : memref<45xf32, #tpu.memory_space<smem>>
    %48 = vector.broadcast %47 : f32 to vector<1x256xf32>
    %49 = arith.mulf %48, %12 : vector<1x256xf32>
    %c5 = arith.constant 5 : index
    %50 = memref.load %arg1[%c5] : memref<45xf32, #tpu.memory_space<smem>>
    %51 = vector.broadcast %50 : f32 to vector<1x256xf32>
    %52 = arith.mulf %51, %13 : vector<1x256xf32>
    %53 = arith.addf %49, %52 : vector<1x256xf32>
    %c8 = arith.constant 8 : index
    %54 = memref.load %arg1[%c8] : memref<45xf32, #tpu.memory_space<smem>>
    %55 = vector.broadcast %54 : f32 to vector<1x256xf32>
    %56 = arith.mulf %55, %14 : vector<1x256xf32>
    %57 = arith.addf %53, %56 : vector<1x256xf32>
    %c2_10 = arith.constant 2 : index
    %58 = memref.load %arg2[%c2_10] : memref<15xf32, #tpu.memory_space<smem>>
    %59 = vector.broadcast %58 : f32 to vector<1x256xf32>
    %60 = arith.addf %57, %59 : vector<1x256xf32>
    %61 = vector.broadcast %3 : f32 to vector<1x256xf32>
    %62 = arith.mulf %61, %60 : vector<1x256xf32>
    %63 = tpu.concatenate %30, %46, %62 in 0 : vector<1x256xf32>, vector<1x256xf32>, vector<1x256xf32> -> vector<3x256xf32>
    %c3_11 = arith.constant 3 : index
    %c0_12 = arith.constant 0 : index
    %64 = vector.load %arg4[%c3_11, %c0_12] : memref<15x256xf32, #tpu.memory_space<vmem>>, vector<1x256xf32>
    %c4_13 = arith.constant 4 : index
    %c0_14 = arith.constant 0 : index
    %65 = vector.load %arg4[%c4_13, %c0_14] : memref<15x256xf32, #tpu.memory_space<vmem>>, vector<1x256xf32>
    %c5_15 = arith.constant 5 : index
    %c0_16 = arith.constant 0 : index
    %66 = vector.load %arg4[%c5_15, %c0_16] : memref<15x256xf32, #tpu.memory_space<vmem>>, vector<1x256xf32>
    %c9 = arith.constant 9 : index
    %67 = memref.load %arg1[%c9] : memref<45xf32, #tpu.memory_space<smem>>
    %68 = vector.broadcast %67 : f32 to vector<1x256xf32>
    %69 = arith.mulf %68, %64 : vector<1x256xf32>
    %c12 = arith.constant 12 : index
    %70 = memref.load %arg1[%c12] : memref<45xf32, #tpu.memory_space<smem>>
    %71 = vector.broadcast %70 : f32 to vector<1x256xf32>
    %72 = arith.mulf %71, %65 : vector<1x256xf32>
    %73 = arith.addf %69, %72 : vector<1x256xf32>
    %c15 = arith.constant 15 : index
    %74 = memref.load %arg1[%c15] : memref<45xf32, #tpu.memory_space<smem>>
    %75 = vector.broadcast %74 : f32 to vector<1x256xf32>
    %76 = arith.mulf %75, %66 : vector<1x256xf32>
    %77 = arith.addf %73, %76 : vector<1x256xf32>
    %c3_17 = arith.constant 3 : index
    %78 = memref.load %arg2[%c3_17] : memref<15xf32, #tpu.memory_space<smem>>
    %79 = vector.broadcast %78 : f32 to vector<1x256xf32>
    %80 = arith.addf %77, %79 : vector<1x256xf32>
    %81 = vector.broadcast %3 : f32 to vector<1x256xf32>
    %82 = arith.mulf %81, %80 : vector<1x256xf32>
    %c10 = arith.constant 10 : index
    %83 = memref.load %arg1[%c10] : memref<45xf32, #tpu.memory_space<smem>>
    %84 = vector.broadcast %83 : f32 to vector<1x256xf32>
    %85 = arith.mulf %84, %64 : vector<1x256xf32>
    %c13 = arith.constant 13 : index
    %86 = memref.load %arg1[%c13] : memref<45xf32, #tpu.memory_space<smem>>
    %87 = vector.broadcast %86 : f32 to vector<1x256xf32>
    %88 = arith.mulf %87, %65 : vector<1x256xf32>
    %89 = arith.addf %85, %88 : vector<1x256xf32>
    %c16 = arith.constant 16 : index
    %90 = memref.load %arg1[%c16] : memref<45xf32, #tpu.memory_space<smem>>
    %91 = vector.broadcast %90 : f32 to vector<1x256xf32>
    %92 = arith.mulf %91, %66 : vector<1x256xf32>
    %93 = arith.addf %89, %92 : vector<1x256xf32>
    %c4_18 = arith.constant 4 : index
    %94 = memref.load %arg2[%c4_18] : memref<15xf32, #tpu.memory_space<smem>>
    %95 = vector.broadcast %94 : f32 to vector<1x256xf32>
    %96 = arith.addf %93, %95 : vector<1x256xf32>
    %97 = vector.broadcast %3 : f32 to vector<1x256xf32>
    %98 = arith.mulf %97, %96 : vector<1x256xf32>
    %c11 = arith.constant 11 : index
    %99 = memref.load %arg1[%c11] : memref<45xf32, #tpu.memory_space<smem>>
    %100 = vector.broadcast %99 : f32 to vector<1x256xf32>
    %101 = arith.mulf %100, %64 : vector<1x256xf32>
    %c14 = arith.constant 14 : index
    %102 = memref.load %arg1[%c14] : memref<45xf32, #tpu.memory_space<smem>>
    %103 = vector.broadcast %102 : f32 to vector<1x256xf32>
    %104 = arith.mulf %103, %65 : vector<1x256xf32>
    %105 = arith.addf %101, %104 : vector<1x256xf32>
    %c17 = arith.constant 17 : index
    %106 = memref.load %arg1[%c17] : memref<45xf32, #tpu.memory_space<smem>>
    %107 = vector.broadcast %106 : f32 to vector<1x256xf32>
    %108 = arith.mulf %107, %66 : vector<1x256xf32>
    %109 = arith.addf %105, %108 : vector<1x256xf32>
    %c5_19 = arith.constant 5 : index
    %110 = memref.load %arg2[%c5_19] : memref<15xf32, #tpu.memory_space<smem>>
    %111 = vector.broadcast %110 : f32 to vector<1x256xf32>
    %112 = arith.addf %109, %111 : vector<1x256xf32>
    %113 = vector.broadcast %3 : f32 to vector<1x256xf32>
    %114 = arith.mulf %113, %112 : vector<1x256xf32>
    %115 = tpu.concatenate %82, %98, %114 in 0 : vector<1x256xf32>, vector<1x256xf32>, vector<1x256xf32> -> vector<3x256xf32>
    %116 = arith.subf %115, %63 : vector<3x256xf32>
    %117 = vector.broadcast %11 : vector<1x256xf32> to vector<3x256xf32>
    %118 = arith.mulf %116, %117 : vector<3x256xf32>
    %119 = arith.mulf %118, %118 : vector<3x256xf32>
    %120 = vector.shape_cast %119 : vector<3x256xf32> to vector<1x3x256xf32>
    %cst = arith.constant dense<0.000000e+00> : vector<1xf32>
    %121 = vector.multi_reduction <add>, %120, %cst [1, 2] : vector<1x3x256xf32> to vector<1xf32>
    %122 = vector.shape_cast %121 : vector<1xf32> to vector<1x1x1xf32>
    %123 = vector.extract %122[0, 0, 0] : f32 from vector<1x1x1xf32>
    %c6_20 = arith.constant 6 : index
    %c0_21 = arith.constant 0 : index
    %124 = vector.load %arg4[%c6_20, %c0_21] : memref<15x256xf32, #tpu.memory_space<vmem>>, vector<1x256xf32>
    %c7_22 = arith.constant 7 : index
    %c0_23 = arith.constant 0 : index
    %125 = vector.load %arg4[%c7_22, %c0_23] : memref<15x256xf32, #tpu.memory_space<vmem>>, vector<1x256xf32>
    %c8_24 = arith.constant 8 : index
    %c0_25 = arith.constant 0 : index
    %126 = vector.load %arg4[%c8_24, %c0_25] : memref<15x256xf32, #tpu.memory_space<vmem>>, vector<1x256xf32>
    %c18 = arith.constant 18 : index
    %127 = memref.load %arg1[%c18] : memref<45xf32, #tpu.memory_space<smem>>
    %128 = vector.broadcast %127 : f32 to vector<1x256xf32>
    %129 = arith.mulf %128, %124 : vector<1x256xf32>
    %c21 = arith.constant 21 : index
    %130 = memref.load %arg1[%c21] : memref<45xf32, #tpu.memory_space<smem>>
    %131 = vector.broadcast %130 : f32 to vector<1x256xf32>
    %132 = arith.mulf %131, %125 : vector<1x256xf32>
    %133 = arith.addf %129, %132 : vector<1x256xf32>
    %c24 = arith.constant 24 : index
    %134 = memref.load %arg1[%c24] : memref<45xf32, #tpu.memory_space<smem>>
    %135 = vector.broadcast %134 : f32 to vector<1x256xf32>
    %136 = arith.mulf %135, %126 : vector<1x256xf32>
    %137 = arith.addf %133, %136 : vector<1x256xf32>
    %c6_26 = arith.constant 6 : index
    %138 = memref.load %arg2[%c6_26] : memref<15xf32, #tpu.memory_space<smem>>
    %139 = vector.broadcast %138 : f32 to vector<1x256xf32>
    %140 = arith.addf %137, %139 : vector<1x256xf32>
    %141 = vector.broadcast %3 : f32 to vector<1x256xf32>
    %142 = arith.mulf %141, %140 : vector<1x256xf32>
    %c19 = arith.constant 19 : index
    %143 = memref.load %arg1[%c19] : memref<45xf32, #tpu.memory_space<smem>>
    %144 = vector.broadcast %143 : f32 to vector<1x256xf32>
    %145 = arith.mulf %144, %124 : vector<1x256xf32>
    %c22 = arith.constant 22 : index
    %146 = memref.load %arg1[%c22] : memref<45xf32, #tpu.memory_space<smem>>
    %147 = vector.broadcast %146 : f32 to vector<1x256xf32>
    %148 = arith.mulf %147, %125 : vector<1x256xf32>
    %149 = arith.addf %145, %148 : vector<1x256xf32>
    %c25 = arith.constant 25 : index
    %150 = memref.load %arg1[%c25] : memref<45xf32, #tpu.memory_space<smem>>
    %151 = vector.broadcast %150 : f32 to vector<1x256xf32>
    %152 = arith.mulf %151, %126 : vector<1x256xf32>
    %153 = arith.addf %149, %152 : vector<1x256xf32>
    %c7_27 = arith.constant 7 : index
    %154 = memref.load %arg2[%c7_27] : memref<15xf32, #tpu.memory_space<smem>>
    %155 = vector.broadcast %154 : f32 to vector<1x256xf32>
    %156 = arith.addf %153, %155 : vector<1x256xf32>
    %157 = vector.broadcast %3 : f32 to vector<1x256xf32>
    %158 = arith.mulf %157, %156 : vector<1x256xf32>
    %c20 = arith.constant 20 : index
    %159 = memref.load %arg1[%c20] : memref<45xf32, #tpu.memory_space<smem>>
    %160 = vector.broadcast %159 : f32 to vector<1x256xf32>
    %161 = arith.mulf %160, %124 : vector<1x256xf32>
    %c23 = arith.constant 23 : index
    %162 = memref.load %arg1[%c23] : memref<45xf32, #tpu.memory_space<smem>>
    %163 = vector.broadcast %162 : f32 to vector<1x256xf32>
    %164 = arith.mulf %163, %125 : vector<1x256xf32>
    %165 = arith.addf %161, %164 : vector<1x256xf32>
    %c26 = arith.constant 26 : index
    %166 = memref.load %arg1[%c26] : memref<45xf32, #tpu.memory_space<smem>>
    %167 = vector.broadcast %166 : f32 to vector<1x256xf32>
    %168 = arith.mulf %167, %126 : vector<1x256xf32>
    %169 = arith.addf %165, %168 : vector<1x256xf32>
    %c8_28 = arith.constant 8 : index
    %170 = memref.load %arg2[%c8_28] : memref<15xf32, #tpu.memory_space<smem>>
    %171 = vector.broadcast %170 : f32 to vector<1x256xf32>
    %172 = arith.addf %169, %171 : vector<1x256xf32>
    %173 = vector.broadcast %3 : f32 to vector<1x256xf32>
    %174 = arith.mulf %173, %172 : vector<1x256xf32>
    %175 = tpu.concatenate %142, %158, %174 in 0 : vector<1x256xf32>, vector<1x256xf32>, vector<1x256xf32> -> vector<3x256xf32>
    %176 = arith.subf %175, %115 : vector<3x256xf32>
    %177 = vector.broadcast %11 : vector<1x256xf32> to vector<3x256xf32>
    %178 = arith.mulf %176, %177 : vector<3x256xf32>
    %179 = arith.mulf %178, %178 : vector<3x256xf32>
    %180 = vector.shape_cast %179 : vector<3x256xf32> to vector<1x3x256xf32>
    %cst_29 = arith.constant dense<0.000000e+00> : vector<1xf32>
    %181 = vector.multi_reduction <add>, %180, %cst_29 [1, 2] : vector<1x3x256xf32> to vector<1xf32>
    %182 = vector.shape_cast %181 : vector<1xf32> to vector<1x1x1xf32>
    %183 = vector.extract %182[0, 0, 0] : f32 from vector<1x1x1xf32>
    %184 = arith.addf %123, %183 : f32
    %c9_30 = arith.constant 9 : index
    %c0_31 = arith.constant 0 : index
    %185 = vector.load %arg4[%c9_30, %c0_31] : memref<15x256xf32, #tpu.memory_space<vmem>>, vector<1x256xf32>
    %c10_32 = arith.constant 10 : index
    %c0_33 = arith.constant 0 : index
    %186 = vector.load %arg4[%c10_32, %c0_33] : memref<15x256xf32, #tpu.memory_space<vmem>>, vector<1x256xf32>
    %c11_34 = arith.constant 11 : index
    %c0_35 = arith.constant 0 : index
    %187 = vector.load %arg4[%c11_34, %c0_35] : memref<15x256xf32, #tpu.memory_space<vmem>>, vector<1x256xf32>
    %c27 = arith.constant 27 : index
    %188 = memref.load %arg1[%c27] : memref<45xf32, #tpu.memory_space<smem>>
    %189 = vector.broadcast %188 : f32 to vector<1x256xf32>
    %190 = arith.mulf %189, %185 : vector<1x256xf32>
    %c30 = arith.constant 30 : index
    %191 = memref.load %arg1[%c30] : memref<45xf32, #tpu.memory_space<smem>>
    %192 = vector.broadcast %191 : f32 to vector<1x256xf32>
    %193 = arith.mulf %192, %186 : vector<1x256xf32>
    %194 = arith.addf %190, %193 : vector<1x256xf32>
    %c33 = arith.constant 33 : index
    %195 = memref.load %arg1[%c33] : memref<45xf32, #tpu.memory_space<smem>>
    %196 = vector.broadcast %195 : f32 to vector<1x256xf32>
    %197 = arith.mulf %196, %187 : vector<1x256xf32>
    %198 = arith.addf %194, %197 : vector<1x256xf32>
    %c9_36 = arith.constant 9 : index
    %199 = memref.load %arg2[%c9_36] : memref<15xf32, #tpu.memory_space<smem>>
    %200 = vector.broadcast %199 : f32 to vector<1x256xf32>
    %201 = arith.addf %198, %200 : vector<1x256xf32>
    %202 = vector.broadcast %3 : f32 to vector<1x256xf32>
    %203 = arith.mulf %202, %201 : vector<1x256xf32>
    %c28 = arith.constant 28 : index
    %204 = memref.load %arg1[%c28] : memref<45xf32, #tpu.memory_space<smem>>
    %205 = vector.broadcast %204 : f32 to vector<1x256xf32>
    %206 = arith.mulf %205, %185 : vector<1x256xf32>
    %c31 = arith.constant 31 : index
    %207 = memref.load %arg1[%c31] : memref<45xf32, #tpu.memory_space<smem>>
    %208 = vector.broadcast %207 : f32 to vector<1x256xf32>
    %209 = arith.mulf %208, %186 : vector<1x256xf32>
    %210 = arith.addf %206, %209 : vector<1x256xf32>
    %c34 = arith.constant 34 : index
    %211 = memref.load %arg1[%c34] : memref<45xf32, #tpu.memory_space<smem>>
    %212 = vector.broadcast %211 : f32 to vector<1x256xf32>
    %213 = arith.mulf %212, %187 : vector<1x256xf32>
    %214 = arith.addf %210, %213 : vector<1x256xf32>
    %c10_37 = arith.constant 10 : index
    %215 = memref.load %arg2[%c10_37] : memref<15xf32, #tpu.memory_space<smem>>
    %216 = vector.broadcast %215 : f32 to vector<1x256xf32>
    %217 = arith.addf %214, %216 : vector<1x256xf32>
    %218 = vector.broadcast %3 : f32 to vector<1x256xf32>
    %219 = arith.mulf %218, %217 : vector<1x256xf32>
    %c29 = arith.constant 29 : index
    %220 = memref.load %arg1[%c29] : memref<45xf32, #tpu.memory_space<smem>>
    %221 = vector.broadcast %220 : f32 to vector<1x256xf32>
    %222 = arith.mulf %221, %185 : vector<1x256xf32>
    %c32 = arith.constant 32 : index
    %223 = memref.load %arg1[%c32] : memref<45xf32, #tpu.memory_space<smem>>
    %224 = vector.broadcast %223 : f32 to vector<1x256xf32>
    %225 = arith.mulf %224, %186 : vector<1x256xf32>
    %226 = arith.addf %222, %225 : vector<1x256xf32>
    %c35 = arith.constant 35 : index
    %227 = memref.load %arg1[%c35] : memref<45xf32, #tpu.memory_space<smem>>
    %228 = vector.broadcast %227 : f32 to vector<1x256xf32>
    %229 = arith.mulf %228, %187 : vector<1x256xf32>
    %230 = arith.addf %226, %229 : vector<1x256xf32>
    %c11_38 = arith.constant 11 : index
    %231 = memref.load %arg2[%c11_38] : memref<15xf32, #tpu.memory_space<smem>>
    %232 = vector.broadcast %231 : f32 to vector<1x256xf32>
    %233 = arith.addf %230, %232 : vector<1x256xf32>
    %234 = vector.broadcast %3 : f32 to vector<1x256xf32>
    %235 = arith.mulf %234, %233 : vector<1x256xf32>
    %236 = tpu.concatenate %203, %219, %235 in 0 : vector<1x256xf32>, vector<1x256xf32>, vector<1x256xf32> -> vector<3x256xf32>
    %237 = arith.subf %236, %175 : vector<3x256xf32>
    %238 = vector.broadcast %11 : vector<1x256xf32> to vector<3x256xf32>
    %239 = arith.mulf %237, %238 : vector<3x256xf32>
    %240 = arith.mulf %239, %239 : vector<3x256xf32>
    %241 = vector.shape_cast %240 : vector<3x256xf32> to vector<1x3x256xf32>
    %cst_39 = arith.constant dense<0.000000e+00> : vector<1xf32>
    %242 = vector.multi_reduction <add>, %241, %cst_39 [1, 2] : vector<1x3x256xf32> to vector<1xf32>
    %243 = vector.shape_cast %242 : vector<1xf32> to vector<1x1x1xf32>
    %244 = vector.extract %243[0, 0, 0] : f32 from vector<1x1x1xf32>
    %245 = arith.addf %184, %244 : f32
    %c12_40 = arith.constant 12 : index
    %c0_41 = arith.constant 0 : index
    %246 = vector.load %arg4[%c12_40, %c0_41] : memref<15x256xf32, #tpu.memory_space<vmem>>, vector<1x256xf32>
    %c13_42 = arith.constant 13 : index
    %c0_43 = arith.constant 0 : index
    %247 = vector.load %arg4[%c13_42, %c0_43] : memref<15x256xf32, #tpu.memory_space<vmem>>, vector<1x256xf32>
    %c14_44 = arith.constant 14 : index
    %c0_45 = arith.constant 0 : index
    %248 = vector.load %arg4[%c14_44, %c0_45] : memref<15x256xf32, #tpu.memory_space<vmem>>, vector<1x256xf32>
    %c36 = arith.constant 36 : index
    %249 = memref.load %arg1[%c36] : memref<45xf32, #tpu.memory_space<smem>>
    %250 = vector.broadcast %249 : f32 to vector<1x256xf32>
    %251 = arith.mulf %250, %246 : vector<1x256xf32>
    %c39 = arith.constant 39 : index
    %252 = memref.load %arg1[%c39] : memref<45xf32, #tpu.memory_space<smem>>
    %253 = vector.broadcast %252 : f32 to vector<1x256xf32>
    %254 = arith.mulf %253, %247 : vector<1x256xf32>
    %255 = arith.addf %251, %254 : vector<1x256xf32>
    %c42 = arith.constant 42 : index
    %256 = memref.load %arg1[%c42] : memref<45xf32, #tpu.memory_space<smem>>
    %257 = vector.broadcast %256 : f32 to vector<1x256xf32>
    %258 = arith.mulf %257, %248 : vector<1x256xf32>
    %259 = arith.addf %255, %258 : vector<1x256xf32>
    %c12_46 = arith.constant 12 : index
    %260 = memref.load %arg2[%c12_46] : memref<15xf32, #tpu.memory_space<smem>>
    %261 = vector.broadcast %260 : f32 to vector<1x256xf32>
    %262 = arith.addf %259, %261 : vector<1x256xf32>
    %263 = vector.broadcast %3 : f32 to vector<1x256xf32>
    %264 = arith.mulf %263, %262 : vector<1x256xf32>
    %c37 = arith.constant 37 : index
    %265 = memref.load %arg1[%c37] : memref<45xf32, #tpu.memory_space<smem>>
    %266 = vector.broadcast %265 : f32 to vector<1x256xf32>
    %267 = arith.mulf %266, %246 : vector<1x256xf32>
    %c40 = arith.constant 40 : index
    %268 = memref.load %arg1[%c40] : memref<45xf32, #tpu.memory_space<smem>>
    %269 = vector.broadcast %268 : f32 to vector<1x256xf32>
    %270 = arith.mulf %269, %247 : vector<1x256xf32>
    %271 = arith.addf %267, %270 : vector<1x256xf32>
    %c43 = arith.constant 43 : index
    %272 = memref.load %arg1[%c43] : memref<45xf32, #tpu.memory_space<smem>>
    %273 = vector.broadcast %272 : f32 to vector<1x256xf32>
    %274 = arith.mulf %273, %248 : vector<1x256xf32>
    %275 = arith.addf %271, %274 : vector<1x256xf32>
    %c13_47 = arith.constant 13 : index
    %276 = memref.load %arg2[%c13_47] : memref<15xf32, #tpu.memory_space<smem>>
    %277 = vector.broadcast %276 : f32 to vector<1x256xf32>
    %278 = arith.addf %275, %277 : vector<1x256xf32>
    %279 = vector.broadcast %3 : f32 to vector<1x256xf32>
    %280 = arith.mulf %279, %278 : vector<1x256xf32>
    %c38 = arith.constant 38 : index
    %281 = memref.load %arg1[%c38] : memref<45xf32, #tpu.memory_space<smem>>
    %282 = vector.broadcast %281 : f32 to vector<1x256xf32>
    %283 = arith.mulf %282, %246 : vector<1x256xf32>
    %c41 = arith.constant 41 : index
    %284 = memref.load %arg1[%c41] : memref<45xf32, #tpu.memory_space<smem>>
    %285 = vector.broadcast %284 : f32 to vector<1x256xf32>
    %286 = arith.mulf %285, %247 : vector<1x256xf32>
    %287 = arith.addf %283, %286 : vector<1x256xf32>
    %c44 = arith.constant 44 : index
    %288 = memref.load %arg1[%c44] : memref<45xf32, #tpu.memory_space<smem>>
    %289 = vector.broadcast %288 : f32 to vector<1x256xf32>
    %290 = arith.mulf %289, %248 : vector<1x256xf32>
    %291 = arith.addf %287, %290 : vector<1x256xf32>
    %c14_48 = arith.constant 14 : index
    %292 = memref.load %arg2[%c14_48] : memref<15xf32, #tpu.memory_space<smem>>
    %293 = vector.broadcast %292 : f32 to vector<1x256xf32>
    %294 = arith.addf %291, %293 : vector<1x256xf32>
    %295 = vector.broadcast %3 : f32 to vector<1x256xf32>
    %296 = arith.mulf %295, %294 : vector<1x256xf32>
    %297 = tpu.concatenate %264, %280, %296 in 0 : vector<1x256xf32>, vector<1x256xf32>, vector<1x256xf32> -> vector<3x256xf32>
    %298 = arith.subf %297, %236 : vector<3x256xf32>
    %299 = vector.broadcast %11 : vector<1x256xf32> to vector<3x256xf32>
    %300 = arith.mulf %298, %299 : vector<3x256xf32>
    %301 = arith.mulf %300, %300 : vector<3x256xf32>
    %302 = vector.shape_cast %301 : vector<3x256xf32> to vector<1x3x256xf32>
    %cst_49 = arith.constant dense<0.000000e+00> : vector<1xf32>
    %303 = vector.multi_reduction <add>, %302, %cst_49 [1, 2] : vector<1x3x256xf32> to vector<1xf32>
    %304 = vector.shape_cast %303 : vector<1xf32> to vector<1x1x1xf32>
    %305 = vector.extract %304[0, 0, 0] : f32 from vector<1x1x1xf32>
    %306 = arith.addf %245, %305 : f32
    %307 = tpu.concatenate %63, %115, %175, %236, %297 in 0 : vector<3x256xf32>, vector<3x256xf32>, vector<3x256xf32>, vector<3x256xf32>, vector<3x256xf32> -> vector<15x256xf32>
    %c0_50 = arith.constant 0 : index
    %c0_51 = arith.constant 0 : index
    %308 = vector.load %arg5[%c0_50, %c0_51] : memref<15x256xf32, #tpu.memory_space<vmem>>, vector<15x256xf32>
    tpu.vector_store %arg5[%c0_50, %c0_51], %307 {strides = array<i32>} : memref<15x256xf32, #tpu.memory_space<vmem>>, vector<15x256xf32>,
    %c0_52 = arith.constant 0 : index
    %309 = memref.load %arg7[%c0_52] : memref<1xf32, #tpu.memory_space<smem>>
    %cst_53 = arith.constant 4.16666677E-4 : f32
    %310 = arith.mulf %306, %cst_53 : f32
    %311 = arith.addf %309, %310 : f32
    %c0_54 = arith.constant 0 : index
    %312 = memref.load %arg7[%c0_54] : memref<1xf32, #tpu.memory_space<smem>>
    memref.store %311, %arg7[%c0_54] : memref<1xf32, #tpu.memory_space<smem>>
    %c0_i32_55 = arith.constant 0 : i32
    %313 = arith.cmpi eq, %arg0, %c0_i32_55 : i32
    %314 = arith.extui %313 : i1 to i32
    %c0_i32_56 = arith.constant 0 : i32
    %315 = arith.cmpi ne, %314, %c0_i32_56 : i32
    scf.if %315 {
      %c0_57 = arith.constant 0 : index
      %316 = memref.load %arg7[%c0_57] : memref<1xf32, #tpu.memory_space<smem>>
      %c0_58 = arith.constant 0 : index
      %317 = memref.load %arg6[%c0_58] : memref<1xf32, #tpu.memory_space<smem>>
      memref.store %316, %arg6[%c0_58] : memref<1xf32, #tpu.memory_space<smem>>
    } else {
    }
    return
  }
  func.func @transform_0(%arg0: i32) -> i32 {
    %c0_i32 = arith.constant 0 : i32
    %c0_i32_0 = arith.constant 0 : i32
    return %c0_i32 : i32
  }
  func.func @transform_1(%arg0: i32) -> i32 {
    %c0_i32 = arith.constant 0 : i32
    %c0_i32_0 = arith.constant 0 : i32
    return %c0_i32 : i32
  }
  func.func @transform_2(%arg0: i32) -> i32 {
    %c0_i32 = arith.constant 0 : i32
    %c0_i32_0 = arith.constant 0 : i32
    return %c0_i32 : i32
  }
  func.func @transform_3(%arg0: i32) -> (i32, i32) {
    %c0_i32 = arith.constant 0 : i32
    %c0_i32_0 = arith.constant 0 : i32
    return %c0_i32, %arg0 : i32, i32
  }
  func.func @transform_4(%arg0: i32) -> (i32, i32) {
    %c0_i32 = arith.constant 0 : i32
    %c0_i32_0 = arith.constant 0 : i32
    return %c0_i32, %arg0 : i32, i32
  }
  func.func @transform_5(%arg0: i32) -> i32 {
    %c0_i32 = arith.constant 0 : i32
    %c0_i32_0 = arith.constant 0 : i32
    return %c0_i32 : i32
  }
}

</mosaic_0001>

<bundles_post_ra>
// kernel: tpu_custom_call.1
= control target key start
LH: loop header
LB: loop body
LE: loop exit
PB: predicated region body
PF: predicated region fallthrough
CT: control target
= control target key end

     0   :  { %12 = vsyncpa [#allocation8], 0  ;;  %s1223_s0 = inlined_call_operand.vmem [shape: f32[45], index: 0, kind: input, shape index: {}]   ;;  %s1224_s1 = inlined_call_operand.vmem [shape: f32[15], index: 1, kind: input, shape index: {}]   ;;  %s1225_s2 = inlined_call_operand.<no memory space> [shape: f32[1], index: 2, kind: input, shape index: {}]   ;;  %s1226_s3 = inlined_call_operand.hbm [shape: f32[15,256], index: 3, kind: input, shape index: {}]   ;;  %s1227_s4 = inlined_call_operand.hbm [shape: f32[15,256], index: 4, kind: output, shape index: {0}]   ;;  %s1228_s5 = inlined_call_operand.hbm [shape: f32[1], index: 5, kind: output, shape index: {1}]  }
   0x1   :  { %13 = vsyncpa [#allocation10], 0 }
   0x2   :  { %14 = vsyncpa [#allocation5], 0 }
   0x3   :  { %15 = vsyncpa [#allocation6], 0 }
   0x4   :  { %16 = vsyncpa [#allocation7], 0  ;;  %s23_s20 = sshll.u32 %s1223_s0, 4  ;;  %s33_s23 = sshll.u32 %s1224_s1, 4  ;;  %s24_s20 = int_to_ptr.vmem [resolvable:$true] %s23_s20  ;;  %s34_s23 = int_to_ptr.vmem [resolvable:$true] %s33_s23 }
   0x5   :  { %s755_s24 = scalar_lea.vmem %s24_s20, 16  ;;  %p760_p1 = scmp.lt.s32.totalorder %s24_s20, %s24_s20 }
   0x6   :  { %p756_p0 = scmp.ne.s32.totalorder %s24_s20, %s755_s24  ;;  %p761_p2 = scmp.lt.s32.totalorder %s755_s24, %s755_s24 }
   0x8   :  { %p762_p3 = por %p761_p2, %p760_p1 }
   0xa   :  { %p763_p4 = pnand %p762_p3, %p756_p0 }
   0xc   :  { %766 = shalt.err (!%p763_p4)
}
   0xd   :  { %s843_s25 = smov [#allocation4]   ;;  %s767_s26 = scalar_lea.vmem %s34_s23, 16 }
   0xe   :  { %26 = dma.vmem_to_smem %s24_s20, 16, %s843_s25, [#allocation8]  }
   0xf   :  { %p768_p5 = scmp.ne.s32.totalorder %s34_s23, %s767_s26  ;;  %p772_p6 = scmp.lt.s32.totalorder %s34_s23, %s34_s23 }
  0x10   :  { %p773_p7 = scmp.lt.s32.totalorder %s767_s26, %s767_s26 }
  0x12   :  { %p774_p8 = por %p773_p7, %p772_p6 }
  0x14   :  { %p775_p9 = pnand %p774_p8, %p768_p5 }
  0x16   :  { %778 = shalt.err (!%p775_p9)
}
  0x17   :  { %s844_s0 = smov [#allocation9]   ;;  %s845_s1 = smov [#allocation11]  }
  0x18   :  { %36 = dma.vmem_to_smem %s34_s23, 16, %s844_s0, [#allocation10]  }
  0x19   :  { %s44_s27 = sshll.u32 %s845_s1, 4  ;;  %s779_s30 = scalar_lea.hbm %s1226_s3, 512  ;;  %s45_s27 = int_to_ptr.vmem [resolvable:$true] %s44_s27 }
  0x1a   :  { %p780_p10 = scmp.ne.s32.totalorder %s1226_s3, %s779_s30  ;;  %p783_p11 = scmp.lt.u32.totalorder %s779_s30, %s1226_s3 }
  0x1c   :  { %p785_p12 = pnand %p783_p11, %p780_p10 }
  0x1e   :  { %788 = shalt.err (!%p785_p12)
}
  0x1f   :  { %s789_s10 = scalar_lea.vmem %s45_s27, 512  ;;  %p794_p0 = scmp.lt.s32.totalorder %s45_s27, %s45_s27 }
  0x20   :  { %p790_p13 = scmp.ne.s32.totalorder %s45_s27, %s789_s10  ;;  %p795_p1 = scmp.lt.s32.totalorder %s789_s10, %s789_s10 }
  0x22   :  { %p796_p2 = por %p795_p1, %p794_p0 }
  0x24   :  { %p797_p3 = pnand %p796_p2, %p790_p13 }
  0x26   :  { %800 = shalt.err (!%p797_p3)
}
  0x27   :  { %s846_s11 = smov 256   ;;  %s847_s12 = smov 16  }
  0x28   :  { %50 = dma.hbm_to_vmem [thread:$0]  %s1226_s3, 512, %s45_s27, [#allocation5], %s846_s11, %s846_s11, %s847_s12  }
  0x29   :  { %833 = dma.done.wait [#allocation8], 16  }
  0x2a   :  { %834 = vsyncadd [#allocation8], 4294967280 }
  0x2b   :  { %835 = dma.done.wait [#allocation10], 16  }
  0x2c   :  { %836 = vsyncadd [#allocation10], 4294967280 }
  0x2d   :  { %837 = dma.done.wait [#allocation5], 512  }
  0x2e   :  { %838 = vsyncadd [#allocation5], 4294966784 }
  0x2f   :  { %60 = sfence }
  0x30   :  { %s703_s15 = sld [smem:[#allocation4 + $0x12]]  ;;  %s704_s16 = sld [smem:[#allocation4 + $0x15]]  ;;  %v68_v0 = vlaneseq  ;;  %v279_v1 = vld [vmem:[#allocation11 + $0x6] ss:$8 sm:$0x3]  ;;  %v938_v28 = vstv %s1225_s2  ;;  %vm165_vm0 = vcmask 1040384  }
  0x31   :  { %s705_s17 = sld [smem:[#allocation4 + $0x18]]  ;;  %v281_v2 = vld [vmem:[#allocation11 + $0x7] ss:$8 sm:$0x3]  ;;  %s902_s18 = sld [smem:[#allocation9 + $0x6]]  ;;  %vm168_vm1 = vcmask 1041408  }
  0x32   :  { %s707_s19 = sld [smem:[#allocation4 + $0x13]]  ;;  %v283_v3 = vld [vmem:[#allocation11 + $0x10] ss:$8 sm:$0x3]  ;;  %s708_s20 = sld [smem:[#allocation4 + $0x16]]  ;;  %v69_v4 = vand.u32 127, %v68_v0 }
  0x33   :  { %s709_s21 = sld [smem:[#allocation4 + $0x19]]  ;;  %s904_s3 = sld [smem:[#allocation9 + $0x7]]  ;;  %v134_v5 = vshrl.u32 %v68_v0, 7  ;;  %v931_v27 = vld [vmem:[#allocation11 + $0x11] ss:$8 sm:$0x3] }
  0x34   :  { %s711_s22 = sld [smem:[#allocation4 + $0x14]]  ;;  %s906_s23 = sld [smem:[#allocation4 + $0x17]]  ;;  %v912_v11 = vadd.s32 128, %v69_v4  ;;  %v388_v32 = vld [vmem:[#allocation11 + $0x12] ss:$8 sm:$0x3] }
  0x35   :  { %s908_s24 = sld [smem:[#allocation4 + $0x1a]]  ;;  %s910_s25 = sld [smem:[#allocation9 + $0x8]]  ;;  %v914_v12 = vsub.s32 0, %v134_v5  ;;  %v940_v33 = vld [vmem:[#allocation11 + $0x13] ss:$8 sm:$0x3] }
  0x36   :  { %v285_v6 = vstv %s703_s15  ;;  %v288_v7 = vstv %s704_s16  ;;  %s916_s26 = sld [smem:[#allocation4 + $0x1b]]  ;;  %s918_s0 = sld [smem:[#allocation4 + $0x1e]]  ;;  %v942_v34 = vsub.s32 1, %v134_v5  ;;  %vm76_vm2 = vcmp.lt.s32.totalorder %v912_v11, 200 }
  0x37   :  { %v286_v8 = vmul.f32 %v285_v6, %v279_v1  ;;  %v289_v9 = vmul.f32 %v288_v7, %v281_v2  ;;  %v292_v10 = vstv %s705_s17  ;;  %s920_s1 = sld [smem:[#allocation4 + $0x21]]  ;;  %v296_v19 = vstv %s902_s18  ;;  %s925_s28 = sld [smem:[#allocation4 + $0x1c]] }
  0x38   :  { %v293_v13 = vmul.f32 %v292_v10, %v283_v3  ;;  %v300_v14 = vstv %s707_s19  ;;  %v303_v17 = vstv %s708_s20  ;;  %s922_s27 = sld [smem:[#allocation9 + $0x9]]  ;;  %s927_s29 = sld [smem:[#allocation4 + $0x1f]]  ;;  %vm265_vm3 = vcmask 1042432  }
  0x39   :  { %v290_v15 = vadd.f32 %v289_v9, %v286_v8  ;;  %v301_v16 = vmul.f32 %v300_v14, %v279_v1  ;;  %v307_v18 = vstv %s709_s21  ;;  %v304_v20 = vmul.f32 %v303_v17, %v281_v2  ;;  %s933_s30 = sld [smem:[#allocation4 + $0x22]]  ;;  %s946_s8 = sld [smem:[#allocation4 + $0x1d]] }
  0x3a   :  { %v308_v21 = vmul.f32 %v307_v18, %v283_v3  ;;  %v315_v22 = vstv %s711_s22  ;;  %v318_v25 = vstv %s906_s23  ;;  %v311_v36 = vstv %s904_s3  ;;  %s948_s9 = sld [smem:[#allocation4 + $0x20]]  ;;  %s952_s2 = sld [smem:[#allocation9 + $0xa]] }
  0x3b   :  { %v294_v23 = vadd.f32 %v293_v13, %v290_v15  ;;  %v316_v24 = vmul.f32 %v315_v22, %v279_v1  ;;  %v322_v26 = vstv %s908_s24  ;;  %v305_v29 = vadd.f32 %v304_v20, %v301_v16  ;;  %s959_s10 = sld [smem:[#allocation4 + $0x23]]  ;;  %s969_s14 = sld [smem:[#allocation4]]  ;;  %v81_v15 = vld [vmem:[#allocation11] ss:$8 sm:$0x3] }
  0x3c   :  { %v319_v30 = vmul.f32 %v318_v25, %v281_v2  ;;  %v323_v31 = vmul.f32 %v322_v26, %v283_v3  ;;  %v326_v37 = vstv %s910_s25  ;;  %v392_v40 = vstv %s916_s26  ;;  %s967_s13 = sld [smem:[#allocation9 + $0xb]]  ;;  %s979_s16 = sld [smem:[#allocation4 + $0x6]]  ;;  %v83_v20 = vld [vmem:[#allocation11 + $0x1] ss:$8 sm:$0x3] }
  0x3d   :  { %v297_v35 = vadd.f32 %v296_v19, %v294_v23  ;;  %v309_v38 = vadd.f32 %v308_v21, %v305_v29  ;;  %v395_v41 = vstv %s918_s0  ;;  %v393_v43 = vmul.f32 %v392_v40, %v931_v27  ;;  %s973_s15 = sld [smem:[#allocation4 + $0x3]]  ;;  %s981_s17 = sld [smem:[#allocation4 + $0x1]]  ;;  %v85_v25 = vld [vmem:[#allocation11 + $0x2] ss:$8 sm:$0x3] }
  0x3e   :  { %v320_v39 = vadd.f32 %v319_v30, %v316_v24  ;;  %v396_v44 = vmul.f32 %v395_v41, %v388_v32  ;;  %v399_v45 = vstv %s920_s1  ;;  %v403_v51 = vstv %s922_s27  ;;  %s989_s18 = sld [smem:[#allocation4 + $0x4]]  ;;  %s991_s19 = sld [smem:[#allocation4 + $0x7]] }
  0x3f   :  { %v298_v42 = vmul.f32 %v297_v35, %v938_v28  ;;  %v312_v46 = vadd.f32 %v311_v36, %v309_v38  ;;  %v400_v48 = vmul.f32 %v399_v45, %v940_v33  ;;  %v407_v52 = vstv %s925_s28  ;;  %s995_s20 = sld [smem:[#allocation9]]  ;;  %s1003_s21 = sld [smem:[#allocation4 + $0x2]] }
  0x40   :  { %v324_v47 = vadd.f32 %v323_v31, %v320_v39  ;;  %v397_v50 = vadd.f32 %v396_v44, %v393_v43  ;;  %v408_v55 = vmul.f32 %v407_v52, %v931_v27  ;;  %v410_v56 = vstv %s927_s29  ;;  %s1009_s3 = sld [smem:[#allocation9 + $0x1]]  ;;  %s1017_s22 = sld [smem:[#allocation4 + $0x5]] }
  0x41   :  { %v333_v49 = vrot.slane %v298_v42, %v914_v12  ;;  %v313_v53 = vmul.f32 %v312_v46, %v938_v28  ;;  %v337_v57 = vrot.slane %v298_v42, %v942_v34  ;;  %v411_v59 = vmul.f32 %v410_v56, %v388_v32  ;;  %s1019_s23 = sld [smem:[#allocation4 + $0x8]]  ;;  %s1026_s24 = sld [smem:[#allocation9 + $0x2]] }
  0x42   :  { %v327_v54 = vadd.f32 %v326_v37, %v324_v47  ;;  %v401_v58 = vadd.f32 %v400_v48, %v397_v50  ;;  %v414_v60 = vstv %s933_s30  ;;  %v422_v3 = vstv %s946_s8  ;;  %s1032_s25 = sld [smem:[#allocation4 + $0x9]]  ;;  %s1034_s26 = sld [smem:[#allocation4 + $0xc]] }
  0x43   :  { %v344_v62 = vrot.slane %v313_v53, %v914_v12  ;;  %v348_v63 = vrot.slane %v313_v53, %v942_v34  ;;  %v415_v0 = vmul.f32 %v414_v60, %v940_v33  ;;  %v412_v2 = vadd.f32 %v411_v59, %v408_v55  ;;  %s1043_s0 = sld [smem:[#allocation4 + $0xf]]  ;;  %s1054_s1 = sld [smem:[#allocation9 + $0x3]] }
  0x44   :  { %v328_v61 = vmul.f32 %v327_v54, %v938_v28  ;;  %v404_v1 = vadd.f32 %v403_v51, %v401_v58  ;;  %v425_v4 = vstv %s948_s9  ;;  %v418_v8 = vstv %s952_s2  ;;  %s1056_s27 = sld [smem:[#allocation4 + $0xa]]  ;;  %s1063_s28 = sld [smem:[#allocation4 + $0xd]] }
  0x45   :  { %v362_v7 = vsel %vm165_vm0, %v333_v49, %v344_v62  ;;  %v363_v9 = vsel %vm165_vm0, %v337_v57, %v348_v63  ;;  %v416_v10 = vadd.f32 %v415_v0, %v412_v2  ;;  %v423_v13 = vmul.f32 %v422_v3, %v931_v27  ;;  %s1065_s29 = sld [smem:[#allocation4 + $0x10]]  ;;  %s1071_s30 = sld [smem:[#allocation4 + $0xb]] }
  0x46   :  { %v355_v5 = vrot.slane %v328_v61, %v914_v12  ;;  %v359_v6 = vrot.slane %v328_v61, %v942_v34  ;;  %v426_v14 = vmul.f32 %v425_v4, %v388_v32  ;;  %v848_v16 = vmov 0.0   ;;  %s1075_s6 = sld [smem:[#allocation9 + $0x4]]  ;;  %s1078_s7 = sld [smem:[#allocation4 + $0xe]] }
  0x47   :  { %v999_v17 = vsel %vm76_vm2, 1.0, %v848_v16  ;;  %v405_v18 = vmul.f32 %v404_v1, %v938_v28  ;;  %v429_v19 = vstv %s959_s10  ;;  %v419_v22 = vadd.f32 %v418_v8, %v416_v10  ;;  %v172_v10 = vld [vmem:[#allocation11 + $0x3] ss:$8 sm:$0x3]  ;;  %s1080_s8 = sld [smem:[#allocation4 + $0x11]]  ;;  %s1085_s9 = sld [smem:[#allocation4 + $0x24]] }
  0x48   :  { %v1006_v21 = vsel %vm168_vm1, %v362_v7, %v355_v5  ;;  %v427_v23 = vadd.f32 %v426_v14, %v423_v13  ;;  %v430_v24 = vmul.f32 %v429_v19, %v940_v33  ;;  %v1012_v11 = vsel %vm168_vm1, %v363_v9, %v359_v6  ;;  %v174_v13 = vld [vmem:[#allocation11 + $0x4] ss:$8 sm:$0x3]  ;;  %s1089_s2 = sld [smem:[#allocation9 + $0x5]]  ;;  %s1091_s10 = sld [smem:[#allocation4 + $0x27]] }
  0x49   :  { %v433_v26 = vstv %s967_s13  ;;  %v440_v27 = vrot.slane %v405_v18, %v914_v12  ;;  %v87_v29 = vstv %s969_s14  ;;  %v420_v30 = vmul.f32 %v419_v22, %v938_v28  ;;  %s1097_s13 = sld [smem:[#allocation4 + $0x2a]]  ;;  %s1102_s14 = sld [smem:[#allocation4 + $0x25]] }
  0x4a   :  { %v431_v31 = vadd.f32 %v430_v24, %v427_v23  ;;  %v88_v32 = vmul.f32 %v87_v29, %v81_v15  ;;  %v90_v33 = vstv %s973_s15  ;;  %v444_v35 = vrot.slane %v405_v18, %v942_v34  ;;  %v176_v23 = vld [vmem:[#allocation11 + $0x5] ss:$8 sm:$0x3]  ;;  %s1104_s15 = sld [smem:[#allocation4 + $0x28]] }
  0x4b   :  { %v91_v36 = vmul.f32 %v90_v33, %v83_v20  ;;  %v94_v37 = vstv %s979_s16  ;;  %v103_v38 = vstv %s981_s17  ;;  %v451_v40 = vrot.slane %v420_v30, %v914_v12  ;;  %s1109_s16 = sld [smem:[#allocation9 + $0xc]]  ;;  %s1113_s17 = sld [smem:[#allocation4 + $0x2b]] }
  0x4c   :  { %v434_v39 = vadd.f32 %v433_v26, %v431_v31  ;;  %v455_v41 = vrot.slane %v420_v30, %v942_v34  ;;  %v95_v42 = vmul.f32 %v94_v37, %v85_v25  ;;  %v104_v44 = vmul.f32 %v103_v38, %v81_v15 }
  0x4d   :  { %v92_v43 = vadd.f32 %v91_v36, %v88_v32  ;;  %v106_v45 = vstv %s989_s18  ;;  %v110_v46 = vstv %s991_s19  ;;  %v469_v48 = vsel %vm165_vm0, %v440_v27, %v451_v40  ;;  %s1115_s18 = sld [smem:[#allocation4 + $0x26]]  ;;  %s1126_s19 = sld [smem:[#allocation4 + $0x29]] }
  0x4e   :  { %v435_v47 = vmul.f32 %v434_v39, %v938_v28  ;;  %v98_v49 = vstv %s995_s20  ;;  %v107_v50 = vmul.f32 %v106_v45, %v83_v20  ;;  %v470_v51 = vsel %vm165_vm0, %v444_v35, %v455_v41  ;;  %s1129_s20 = sld [smem:[#allocation9 + $0xd]] }
  0x4f   :  { %v96_v52 = vadd.f32 %v95_v42, %v92_v43  ;;  %v111_v53 = vmul.f32 %v110_v46, %v85_v25  ;;  %v118_v54 = vstv %s1003_s21  ;;  %v114_v60 = vstv %s1009_s3  ;;  %s1134_s21 = sld [smem:[#allocation4 + $0x2c]]  ;;  %s1141_s3 = sld [smem:[#allocation9 + $0xe]] }
  0x50   :  { %v462_v55 = vrot.slane %v435_v47, %v914_v12  ;;  %v466_v56 = vrot.slane %v435_v47, %v942_v34  ;;  %v108_v57 = vadd.f32 %v107_v50, %v104_v44  ;;  %v119_v58 = vmul.f32 %v118_v54, %v81_v15 }
  0x51   :  { %v99_v59 = vadd.f32 %v98_v49, %v96_v52  ;;  %v121_v61 = vstv %s1017_s22  ;;  %v125_v62 = vstv %s1019_s23  ;;  %v129_v5 = vstv %s1026_s24  ;;  %s849_s22 = smov [#allocation12]  }
  0x52   :  { %v1049_v63 = vsel %vm168_vm1, %v469_v48, %v462_v55  ;;  %v1052_v0 = vsel %vm168_vm1, %v470_v51, %v466_v56  ;;  %v112_v1 = vadd.f32 %v111_v53, %v108_v57  ;;  %v122_v2 = vmul.f32 %v121_v61, %v83_v20  ;;  %v493_v57 = vld [vmem:[#allocation11 + $0x14] ss:$8 sm:$0x3]  ;;  %s653_s23 = sshll.u32 %s849_s22, 4  ;;  %s654_s23 = int_to_ptr.vmem [resolvable:$true] %s653_s23 }
  0x53   :  { %v473_v3 = vsub.f32 %v1049_v63, %v1006_v21  ;;  %v474_v4 = vsub.f32 %v1052_v0, %v1012_v11  ;;  %v101_v6 = vmul.f32 %v938_v28, %v99_v59  ;;  %v126_v9 = vmul.f32 %v125_v62, %v85_v25  ;;  %v495_v62 = vld [vmem:[#allocation11 + $0x15] ss:$8 sm:$0x3]  ;;  %s801_s24 = scalar_lea.vmem %s654_s23, 512  ;;  %p806_p5 = scmp.lt.s32.totalorder %s654_s23, %s654_s23 }
  0x54   :  { %v115_v7 = vadd.f32 %v114_v60, %v112_v1  ;;  %v123_v8 = vadd.f32 %v122_v2, %v119_v58  ;;  %v178_v16 = vstv %s1032_s25  ;;  %v181_v18 = vstv %s1034_s26  ;;  %p802_p4 = scmp.ne.s32.totalorder %s654_s23, %s801_s24  ;;  %p807_p6 = scmp.lt.s32.totalorder %s801_s24, %s801_s24 }
  0x55   :  { %v476_v14 = vmul.f32 %v999_v17, %v474_v4  ;;  %v477_v15 = vmul.f32 %v473_v3, %v473_v3  ;;  %v136_v22 = vrot.slane %v101_v6, %v914_v12  ;;  %v179_v26 = vmul.f32 %v178_v16, %v172_v10  ;;  %v497_v4 = vld [vmem:[#allocation11 + $0x16] ss:$8 sm:$0x3] }
  0x56   :  { %v116_v19 = vmul.f32 %v115_v7, %v938_v28  ;;  %v127_v20 = vadd.f32 %v126_v9, %v123_v8  ;;  %v182_v27 = vmul.f32 %v181_v18, %v174_v13  ;;  %v140_v30 = vrot.slane %v101_v6, %v942_v34  ;;  %p808_p7 = por %p807_p6, %p806_p5 }
  0x57   :  { %v478_v24 = vmul.f32 %v476_v14, %v476_v14  ;;  %v479_v25 = vsel %vm265_vm3, %v477_v15, 0.0  ;;  %v185_v32 = vstv %s1043_s0  ;;  %v189_v40 = vstv %s1054_s1 }
  0x58   :  { %v130_v29 = vadd.f32 %v129_v5, %v127_v20  ;;  %v147_v31 = vrot.slane %v116_v19, %v914_v12  ;;  %v151_v35 = vrot.slane %v116_v19, %v942_v34  ;;  %v183_v36 = vadd.f32 %v182_v27, %v179_v26  ;;  %p809_p8 = pnand %p808_p7, %p802_p4 }
  0x59   :  { %v480_v33 = vsel %vm265_vm3, %v478_v24, 0.0  ;;  %v186_v37 = vmul.f32 %v185_v32, %v176_v23  ;;  %v193_v42 = vstv %s1056_s27  ;;  %v196_v43 = vstv %s1063_s28 }
  0x5a   :  { %v481_v38 = vadd.f32 %v480_v33, %v479_v25  ;;  %v1094_v39 = vmul.f32 %v130_v29, %v938_v28  ;;  %v200_v44 = vstv %s1065_s29  ;;  %v166_v46 = vsel %vm165_vm0, %v136_v22, %v147_v31 }
  0x5b   :  { %v187_v41 = vadd.f32 %v186_v37, %v183_v36  ;;  %v194_v47 = vmul.f32 %v193_v42, %v172_v10  ;;  %v197_v48 = vmul.f32 %v196_v43, %v174_v13  ;;  %v167_v49 = vsel %vm165_vm0, %v140_v30, %v151_v35 }
  0x5c   :  { %482 = vadd.xlane.f32.xlu1 %v481_v38  ;;  %v158_v45 = vrot.slane %v1094_v39, %v914_v12  ;;  %v201_v51 = vmul.f32 %v200_v44, %v176_v23  ;;  %v208_v52 = vstv %s1071_s30  ;;  %v162_v53 = vrot.slane %v1094_v39, %v942_v34 }
  0x5d   :  { %v190_v50 = vadd.f32 %v189_v40, %v187_v41  ;;  %v198_v54 = vadd.f32 %v197_v48, %v194_v47  ;;  %v204_v55 = vstv %s1075_s6  ;;  %v209_v56 = vmul.f32 %v208_v52, %v172_v10 }
  0x5e   :  { %v1121_v58 = vsel %vm168_vm1, %v166_v46, %v158_v45  ;;  %v211_v60 = vstv %s1078_s7  ;;  %v215_v61 = vstv %s1080_s8  ;;  %v499_v5 = vstv %s1085_s9 }
  0x5f   :  { %v191_v59 = vmul.f32 %v190_v50, %v938_v28  ;;  %v202_v1 = vadd.f32 %v201_v51, %v198_v54  ;;  %v212_v2 = vmul.f32 %v211_v60, %v174_v13  ;;  %v216_v3 = vmul.f32 %v215_v61, %v176_v23 }
  0x60   :  { %v219_v6 = vstv %s1089_s2  ;;  %v500_v8 = vmul.f32 %v499_v5, %v493_v57  ;;  %v502_v9 = vstv %s1091_s10  ;;  %v506_v15 = vstv %s1097_s13 }
  0x61   :  { %v226_v7 = vrot.slane %v191_v59, %v914_v12  ;;  %v205_v10 = vadd.f32 %v204_v55, %v202_v1  ;;  %v213_v14 = vadd.f32 %v212_v2, %v209_v56  ;;  %v503_v13 = vmul.f32 %v502_v9, %v495_v62 }
  0x62   :  { %v230_v16 = vrot.slane %v191_v59, %v942_v34  ;;  %v507_v18 = vmul.f32 %v506_v15, %v497_v4  ;;  %v514_v19 = vstv %s1102_s14  ;;  %v517_v20 = vstv %s1104_s15 }
  0x63   :  { %v206_v22 = vmul.f32 %v205_v10, %v938_v28  ;;  %v217_v23 = vadd.f32 %v216_v3, %v213_v14  ;;  %v504_v24 = vadd.f32 %v503_v13, %v500_v8  ;;  %v515_v25 = vmul.f32 %v514_v19, %v493_v57 }
  0x64   :  { %v510_v26 = vstv %s1109_s16  ;;  %v518_v27 = vmul.f32 %v517_v20, %v495_v62  ;;  %v521_v29 = vstv %s1113_s17  ;;  %v529_v30 = vstv %s1115_s18 }
  0x65   :  { %v220_v31 = vadd.f32 %v219_v6, %v217_v23  ;;  %v237_v32 = vrot.slane %v206_v22, %v914_v12  ;;  %v241_v33 = vrot.slane %v206_v22, %v942_v34  ;;  %v508_v35 = vadd.f32 %v507_v18, %v504_v24 }
  0x66   :  { %v519_v36 = vadd.f32 %v518_v27, %v515_v25  ;;  %v522_v37 = vmul.f32 %v521_v29, %v497_v4  ;;  %v530_v38 = vmul.f32 %v529_v30, %v493_v57  ;;  %v532_v39 = vstv %s1126_s19 }
  0x67   :  { %v221_v40 = vmul.f32 %v220_v31, %v938_v28  ;;  %v255_v41 = vsel %vm165_vm0, %v226_v7, %v237_v32  ;;  %v511_v42 = vadd.f32 %v510_v26, %v508_v35  ;;  %v525_v43 = vstv %s1129_s20 }
  0x68   :  { %v256_v44 = vsel %vm165_vm0, %v230_v16, %v241_v33  ;;  %v523_v45 = vadd.f32 %v522_v37, %v519_v36  ;;  %v533_v46 = vmul.f32 %v532_v39, %v495_v62  ;;  %v536_v47 = vstv %s1134_s21 }
  0x69   :  { %v170_v48 = vsel %vm168_vm1, %v167_v49, %v162_v53  ;;  %v248_v50 = vrot.slane %v221_v40, %v914_v12  ;;  %v252_v51 = vrot.slane %v221_v40, %v942_v34  ;;  %v537_v52 = vmul.f32 %v536_v47, %v497_v4 }
  0x6a   :  { %v512_v54 = vmul.f32 %v511_v42, %v938_v28  ;;  %v526_v55 = vadd.f32 %v525_v43, %v523_v45  ;;  %v534_v56 = vadd.f32 %v533_v46, %v530_v38  ;;  %v540_v60 = vstv %s1141_s3 }
  0x6b   :  { %v257_v57 = vsel %vm168_vm1, %v255_v41, %v248_v50  ;;  %v258_v59 = vsel %vm168_vm1, %v256_v44, %v252_v51  ;;  %v607_v39 = vrot.slane %v1006_v21, 2  ;;  %v608_v40 = vrot.slane %v1012_v11, 2 }
  0x6c   :  { %v259_v61 = vsub.f32 %v257_v57, %v1121_v58  ;;  %v260_v62 = vsub.f32 %v258_v59, %v170_v48  ;;  %v601_v1 = vrot.slane %v257_v57, 5  ;;  %v547_v49 = vrot.slane %v512_v54, %v914_v12 }
  0x6d   :  { %v527_v53 = vmul.f32 %v526_v55, %v938_v28  ;;  %v538_v2 = vadd.f32 %v537_v52, %v534_v56  ;;  %v366_v3 = vsub.f32 %v1006_v21, %v257_v57  ;;  %v367_v4 = vsub.f32 %v1012_v11, %v258_v59 }
  0x6e   :  { %v262_v5 = vmul.f32 %v999_v17, %v260_v62  ;;  %v263_v6 = vmul.f32 %v259_v61, %v259_v61  ;;  %v623_v7 = vsel %vm265_vm3, %v1121_v58, %v601_v1  ;;  %v551_v8 = vrot.slane %v512_v54, %v942_v34 }
  0x6f   :  { %v541_v9 = vadd.f32 %v540_v60, %v538_v2  ;;  %v558_v10 = vrot.slane %v527_v53, %v914_v12  ;;  %v562_v14 = vrot.slane %v527_v53, %v942_v34  ;;  %v369_v13 = vmul.f32 %v999_v17, %v367_v4 }
  0x70   :  { %v264_v15 = vmul.f32 %v262_v5, %v262_v5  ;;  %v266_v16 = vsel %vm265_vm3, %v263_v6, 0.0  ;;  %v370_v18 = vmul.f32 %v366_v3, %v366_v3  ;;  %v613_v41 = vrot.slane %v1049_v63, 7 }
  0x71   :  { %v542_v19 = vmul.f32 %v541_v9, %v938_v28  ;;  %v371_v20 = vmul.f32 %v369_v13, %v369_v13  ;;  %v576_v58 = vsel %vm165_vm0, %v547_v49, %v558_v10  ;;  %v577_v23 = vsel %vm165_vm0, %v551_v8, %v562_v14 }
  0x72   :  { %v267_v22 = vsel %vm265_vm3, %v264_v15, 0.0  ;;  %v372_v24 = vsel %vm265_vm3, %v370_v18, 0.0  ;;  %v614_v42 = vrot.slane %v1052_v0, 7  ;;  %v602_v43 = vrot.slane %v258_v59, 5 }
  0x73   :  { %v268_v25 = vadd.f32 %v267_v22, %v266_v16  ;;  %v569_v26 = vrot.slane %v542_v19, %v914_v12  ;;  %v573_v27 = vrot.slane %v542_v19, %v942_v34  ;;  %v373_v29 = vsel %vm265_vm3, %v371_v20, 0.0 }
  0x74   :  { %v374_v31 = vadd.f32 %v373_v29, %v372_v24  ;;  %v624_v45 = vsel %vm265_vm3, %v170_v48, %v602_v43  ;;  %vm625_vm4 = vcmask 1045504   ;;  %v628_v46 = vsel %vm165_vm0, %v607_v39, %v613_v41 }
  0x75   :  { %269 = vadd.xlane.f32.xlu0 %v268_v25  ;;  %v578_v30 = vsel %vm168_vm1, %v576_v58, %v569_v26  ;;  %v579_v28 = vsel %vm168_vm1, %v577_v23, %v573_v27  ;;  %v629_v47 = vsel %vm165_vm0, %v608_v40, %v614_v42  ;;  %v626_v50 = vsel %vm625_vm4, %v623_v7, %v607_v39 }
  0x76   :  { %v580_v32 = vsub.f32 %v578_v30, %v1049_v63  ;;  %v581_v33 = vsub.f32 %v579_v28, %v1052_v0  ;;  %v619_v44 = vrot.slane %v578_v30, 4  ;;  %v627_v51 = vsel %vm625_vm4, %v624_v45, %v608_v40  ;;  %633 = vst [vmem:[#allocation12] sm:$0xff] %v626_v50 }
  0x77   :  { %vm630_vm5 = vcmask 1043456   ;;  %634 = vst [vmem:[#allocation12 + $0x8] sm:$0xff] %v627_v51 }
  0x78   :  { %v583_v35 = vmul.f32 %v999_v17, %v581_v33  ;;  %v584_v36 = vmul.f32 %v580_v32, %v580_v32  ;;  %v620_v17 = vrot.slane %v579_v28, 4  ;;  %v631_v21 = vsel %vm630_vm5, %v628_v46, %v619_v44 }
  0x79   :  { %375 = vadd.xlane.f32.xlu0 %v374_v31  ;;  %635 = vst [vmem:[#allocation12 + $0x10] sm:$0x7f] %v631_v21 }
  0x7a   :  { %v585_v37 = vmul.f32 %v583_v35, %v583_v35  ;;  %v586_v12 = vsel %vm265_vm3, %v584_v36, 0.0  ;;  %v632_v11 = vsel %vm630_vm5, %v629_v47, %v620_v17 }
  0x7b   :  { %636 = vst [vmem:[#allocation12 + $0x18] sm:$0x7f] %v632_v11 }
  0x7c   :  { %v587_v34 = vsel %vm265_vm3, %v585_v37, 0.0 }
  0x7d   :  { %v588_v38 = vadd.f32 %v587_v34, %v586_v12 }
  0x7f   :  { %589 = vadd.xlane.f32.xlu1 %v588_v38 }
  0x80   :  { %812 = shalt.err (!%p809_p8)
}
  0x81   :  { %s813_s0 = scalar_lea.hbm %s1227_s4, 512 }
  0x82   :  { %p814_p9 = scmp.ne.s32.totalorder %s1227_s4, %s813_s0  ;;  %p817_p10 = scmp.lt.u32.totalorder %s813_s0, %s1227_s4 }
  0x84   :  { %p819_p11 = pnand %p817_p10, %p814_p9 }
  0x86   :  { %822 = shalt.err (!%p819_p11)
}
  0x87   :  { %659 = dma.vmem_to_hbm [thread:$0]  %s654_s23, 512, %s1227_s4, [#allocation6], %s846_s11, %s846_s11, %s847_s12  }
  0x88   :  { %s823_s15 = scalar_lea.hbm %s1228_s5, 16 }
  0x89   :  { %p824_p12 = scmp.ne.s32.totalorder %s1228_s5, %s823_s15  ;;  %p827_p13 = scmp.lt.u32.totalorder %s823_s15, %s1228_s5 }
  0x8b   :  { %p829_p0 = pnand %p827_p13, %p824_p12 }
  0xe9   :  { %v483_v63 = vpop.xlane.xlu1 %482 }
  0xea   :  { %v484_v0 = vrot.slane %v483_v63, 4 }
  0xec   :  { %v485_v48 = vadd.f32 %v484_v0, %v483_v63 }
  0xee   :  { %v486_v56 = vrot.slane %v485_v48, 2 }
  0xf0   :  { %v487_v1 = vadd.f32 %v486_v56, %v485_v48 }
  0xf2   :  { %v488_v6 = vrot.slane %v487_v1, 1 }
  0xf4   :  { %v489_v14 = vadd.f32 %v488_v6, %v487_v1 }
 0x102   :  { %v270_v52 = vpop.xlane.xlu0 %269 }
 0x103   :  { %v271_v54 = vrot.slane %v270_v52, 4 }
 0x105   :  { %v272_v55 = vadd.f32 %v271_v54, %v270_v52 }
 0x106   :  { %v376_v57 = vpop.xlane.xlu0 %375 }
 0x107   :  { %v273_v59 = vrot.slane %v272_v55, 2  ;;  %v377_v60 = vrot.slane %v376_v57, 4 }
 0x109   :  { %v378_v61 = vadd.f32 %v377_v60, %v376_v57  ;;  %v274_v62 = vadd.f32 %v273_v59, %v272_v55 }
 0x10b   :  { %v379_v49 = vrot.slane %v378_v61, 2  ;;  %v275_v53 = vrot.slane %v274_v62, 1 }
 0x10c   :  { %v590_v2 = vpop.xlane.xlu1 %589 }
 0x10d   :  { %v591_v3 = vrot.slane %v590_v2, 4  ;;  %v380_v4 = vadd.f32 %v379_v49, %v378_v61  ;;  %v276_v5 = vadd.f32 %v275_v53, %v274_v62 }
 0x10f   :  { %v592_v7 = vadd.f32 %v591_v3, %v590_v2  ;;  %739 = vpush %v276_v5  ;;  %v381_v8 = vrot.slane %v380_v4, 1 }
 0x111   :  { %v593_v9 = vrot.slane %v592_v7, 2  ;;  %v382_v10 = vadd.f32 %v381_v8, %v380_v4 }
 0x113   :  { %v594_v13 = vadd.f32 %v593_v9, %v592_v7  ;;  %741 = vpush %v382_v10 }
 0x114   :  { %743 = vpush %v489_v14 }
 0x115   :  { %v595_v15 = vrot.slane %v594_v13, 1 }
 0x117   :  { %v596_v16 = vadd.f32 %v595_v15, %v594_v13 }
 0x119   :  { %745 = vpush %v596_v16 }
 0x140   :  { %s740_s4 = spop %739 }
 0x144   :  { %s742_s11 = spop %741 }
 0x145   :  { %s384_s12 = sadd.f32 %s742_s11, %s740_s4  ;;  %s744_s7 = spop %743 }
 0x147   :  { %s491_s8 = sadd.f32 %s744_s7, %s384_s12 }
 0x14a   :  { %s746_s9 = spop %745 }
 0x14b   :  { %s598_s2 = sadd.f32 %s746_s9, %s491_s8 }
 0x14d   :  { %s638_s10 = smul.f32 0.00041666668, %s598_s2 }
 0x14f   :  { %647 = sst [smem:[#allocation13]] %s638_s10 }
 0x150   :  { %832 = shalt.err (!%p829_p0)
}
 0x151   :  { %s850_s20 = smov [#allocation13]  }
 0x152   :  { %667 = dma.smem_to_hbm %s850_s20, 16, %s1228_s5, [#allocation7]  }
 0x153   :  { %839 = dma.done.wait [#allocation6], 512  }
 0x154   :  { %840 = vsyncadd [#allocation6], 4294966784 }
 0x155   :  { %841 = dma.done.wait [#allocation7], 16  }
 0x156   :  { %842 = vsyncadd [#allocation7], 4294967280 }
 0x157   :  { %674 = sfence }
 0x158   :  { %675 = vsyncpa [#allocation5], 1 }
 0x159   :  { %676 = vsyncpa [#allocation6], 1 }
 0x15a   :  { %677 = vsyncpa [#allocation7], 1 }
 0x15b   :  { %678 = vsyncpa [#allocation8], 1 }
 0x15c   :  { %679 = vsyncpa [#allocation10], 1 }

</bundles_post_ra>
